<compile_context>
chip_gen: v7x
topology: tpu7x:2x2x1
jax: 0.10.0
libtpu: 0.0.40
codegen_flags: <defaults>
</compile_context>

<pallas_src>
import jax
import jax.numpy as jnp
from jax.experimental import pallas as pl
from jax.experimental.pallas import tpu as pltpu


def _round_up(v, m):
    return ((v + m - 1) // m) * m


def _qvalue_kernel(xa_ref, w1_ref, b1_ref, w2_ref, b2_ref, w3_ref, b3_ref,
                   out_ref):
    # fc1 + ReLU  ([x, a] packed wrapper-side -> a single K=(S+A) matmul)
    h1 = jnp.dot(xa_ref[...], w1_ref[...],
                 preferred_element_type=jnp.float32) + b1_ref[...]
    h1 = jnp.maximum(h1, 0.0)

    # fc2 + ReLU
    h2 = jnp.dot(h1, w2_ref[...],
                 preferred_element_type=jnp.float32) + b2_ref[...]
    h2 = jnp.maximum(h2, 0.0)

    # fc3 (H -> 1): VPU multiply + lane (XLU) reduction; w3 is a zero-padded
    # (1, Hp) row, b3 an SMEM scalar.
    q = jnp.sum(h2 * w3_ref[...], axis=-1, keepdims=True) + b3_ref[0, 0]
    # NOTE: (tb, 1) output => masked one-lane stores; only worth transposing to
    # a lane-dense (1, tb) slab if a profile shows a store-bound gap (v5e).
    out_ref[...] = q.astype(out_ref.dtype)


def prep_params(params, *, lane=128):
    """One-time conversion of torch-layout params to the kernel layout.

    torch layout: w1 (H, S+A), w2 (H, H), w3 (1, H), b* (out,).
    kernel layout: weights transposed to (in, Hp) with the hidden dim
    zero-padded to a multiple of `lane` for lane-dense intermediates. Zero
    padding keeps the math exact (padded h1/h2 lanes stay 0 through ReLU, and
    padded w3 lanes contribute 0 to the final reduction)."""
    f32 = jnp.float32
    w1, w2, w3 = params["w1"], params["w2"], params["w3"]
    b1, b2, b3 = params["b1"], params["b2"], params["b3"]
    H = w1.shape[0]
    Hp = _round_up(H, lane)
    ph = Hp - H
    return {
        "w1": jnp.pad(w1.T.astype(f32), ((0, 0), (0, ph))),            # (S+A, Hp)
        "b1": jnp.pad(b1.astype(f32).reshape(1, -1), ((0, 0), (0, ph))),
        "w2": jnp.pad(w2.T.astype(f32), ((0, ph), (0, ph))),           # (Hp, Hp)
        "b2": jnp.pad(b2.astype(f32).reshape(1, -1), ((0, 0), (0, ph))),
        "w3": jnp.pad(w3.astype(f32).reshape(1, -1), ((0, 0), (0, ph))),  # (1, Hp)
        "b3": b3.astype(f32).reshape(1, 1),                            # (1, 1) SMEM
    }


def qvalue_net_forward(x, a, kparams, *, row_block=2048):
    """x: (B, n_states), a: (B, n_actions); kparams from prep_params().

    row_block is VMEM-budget-driven: 2048 is safe under v5e's 16 MiB scoped
    default (~8 MiB live); v6e/v7x can use 4096+ (raise vmem_limit_bytes for
    8192)."""
    x = x.astype(jnp.float32)
    a = a.astype(jnp.float32)
    B = x.shape[0]
    D = kparams["w1"].shape[0]        # S + A
    Hp = kparams["w2"].shape[0]

    # Fuse torch's cat([x, a], dim=1) wrapper-side: a single packed operand
    # means ONE layer-1 matmul in the kernel and one input DMA stream.
    xa = jnp.concatenate([x, a], axis=1)

    if B <= 1024:
        # Small batch: single full-array block (no padding, one grid step).
        tb, n_blocks, bp = B, 1, B
    else:
        # Large batch: big row blocks, but always >= 2 grid steps so
        # "parallel" can shard across both v7x TensorCores.
        n_target = max(2, pl.cdiv(B, row_block))
        tb = _round_up(pl.cdiv(B, n_target), 8)
        n_blocks = pl.cdiv(B, tb)
        bp = n_blocks * tb
        xa = jnp.pad(xa, ((0, bp - B), (0, 0)))

    row = lambda i: (i, 0)      # batch-blocked operands
    rep = lambda i: (0, 0)      # weights: same block every step -> VMEM-resident
    resident = pl.Buffered(1)   # weights never re-DMA -> single buffer is enough

    out = pl.pallas_call(
        _qvalue_kernel,
        out_shape=jax.ShapeDtypeStruct((bp, 1), jnp.float32),
        grid=(n_blocks,),
        in_specs=[
            pl.BlockSpec((tb, D), row),                              # [x, a]
            pl.BlockSpec((D, Hp), rep, pipeline_mode=resident),      # w1
            pl.BlockSpec((1, Hp), rep, pipeline_mode=resident),      # b1
            pl.BlockSpec((Hp, Hp), rep, pipeline_mode=resident),     # w2
            pl.BlockSpec((1, Hp), rep, pipeline_mode=resident),      # b2
            pl.BlockSpec((1, Hp), rep, pipeline_mode=resident),      # w3
            pl.BlockSpec(memory_space=pltpu.MemorySpace.SMEM),       # b3 scalar
        ],
        out_specs=pl.BlockSpec((tb, 1), row),
        compiler_params=pltpu.CompilerParams(
            dimension_semantics=("parallel",)),
    )(xa, kparams["w1"], kparams["b1"], kparams["w2"], kparams["b2"],
      kparams["w3"], kparams["b3"])

    return out[:B]


def init_params(key, n_states, n_actions, n_hiddens):
    """Deterministic init mimicking nn.Linear default (uniform +/- 1/sqrt(fan_in)).
    Weights stored in PyTorch layout: (out_features, in_features)."""
    keys = jax.random.split(key, 6)
    d_in = n_states + n_actions

    def lin(kw, kb, fan_in, fan_out):
        bound = 1.0 / jnp.sqrt(fan_in)
        w = jax.random.uniform(kw, (fan_out, fan_in), jnp.float32, -bound, bound)
        b = jax.random.uniform(kb, (fan_out,), jnp.float32, -bound, bound)
        return w, b

    w1, b1 = lin(keys[0], keys[1], d_in, n_hiddens)
    w2, b2 = lin(keys[2], keys[3], n_hiddens, n_hiddens)
    w3, b3 = lin(keys[4], keys[5], n_hiddens, 1)
    return {"w1": w1, "b1": b1, "w2": w2, "b2": b2, "w3": w3, "b3": b3}


def _reference(x, a, params):
    cat = jnp.concatenate([x, a], axis=1)
    h1 = jnp.maximum(cat @ params["w1"].T + params["b1"], 0.0)
    h2 = jnp.maximum(h1 @ params["w2"].T + params["b2"], 0.0)
    return h2 @ params["w3"].T + params["b3"]


if __name__ == "__main__":
    # Pendulum-v1: observation dim = 3, action dim = 1.
    n_states, n_actions, n_hiddens = 3, 1, 32
    batch = 2

    key = jax.random.PRNGKey(0)
    kx, ka, kp = jax.random.split(key, 3)

    x = jax.random.normal(kx, (batch, n_states), jnp.float32)
    a = jax.random.normal(ka, (batch, n_actions), jnp.float32)

    params = init_params(kp, n_states, n_actions, n_hiddens)   # torch layout
    kparams = prep_params(params)                              # kernel layout, once

    q = qvalue_net_forward(x, a, kparams)
    q = jax.block_until_ready(q)

    q_ref = _reference(x, a, params)
    assert q.shape == (batch, 1)
    assert jnp.allclose(q, q_ref, atol=1e-5, rtol=1e-5)

    # Also exercise the multi-block (grid >= 2, padded-batch) path.
    kx2, ka2 = jax.random.split(jax.random.PRNGKey(1))
    xb = jax.random.normal(kx2, (1032, n_states), jnp.float32)
    ab = jax.random.normal(ka2, (1032, n_actions), jnp.float32)
    qb = jax.block_until_ready(qvalue_net_forward(xb, ab, kparams))
    assert qb.shape == (1032, 1)
    assert jnp.allclose(qb, _reference(xb, ab, params), atol=1e-5, rtol=1e-5)

    print("KERNEL_OK")
</pallas_src>

<mosaic_0001>
module attributes {stable_mosaic.version = 11 : i64} {
  func.func @_qvalue_kernel(%arg0: i32, %arg1: memref<2x4xf32, #tpu.memory_space<vmem>>, %arg2: memref<4x128xf32, #tpu.memory_space<vmem>>, %arg3: memref<1x128xf32, #tpu.memory_space<vmem>>, %arg4: memref<128x128xf32, #tpu.memory_space<vmem>>, %arg5: memref<1x128xf32, #tpu.memory_space<vmem>>, %arg6: memref<1x128xf32, #tpu.memory_space<vmem>>, %arg7: memref<1x1xf32, #tpu.memory_space<smem>>, %arg8: memref<2x1xf32, #tpu.memory_space<vmem>>) attributes {dimension_semantics = [#tpu.dimension_semantics<parallel>], iteration_bounds = array<i64: 1>, scalar_prefetch = 0 : i64, scratch_operands = 0 : i64, tpu.core_type = #tpu.core_type<tc>, window_params = [{transform_indices = @transform_0, window_bounds = array<i64: 2, 4>}, {pipeline_mode = #tpu.pipeline_mode<synchronous>, transform_indices = @transform_1, window_bounds = array<i64: 4, 128>}, {pipeline_mode = #tpu.pipeline_mode<synchronous>, transform_indices = @transform_2, window_bounds = array<i64: 1, 128>}, {pipeline_mode = #tpu.pipeline_mode<synchronous>, transform_indices = @transform_3, window_bounds = array<i64: 128, 128>}, {pipeline_mode = #tpu.pipeline_mode<synchronous>, transform_indices = @transform_4, window_bounds = array<i64: 1, 128>}, {pipeline_mode = #tpu.pipeline_mode<synchronous>, transform_indices = @transform_5, window_bounds = array<i64: 1, 128>}, {transform_indices = @transform_6, window_bounds = array<i64: 1, 1>}, {transform_indices = @transform_7, window_bounds = array<i64: 2, 1>}]} {
    %c0 = arith.constant 0 : index
    %c0_0 = arith.constant 0 : index
    %0 = vector.load %arg1[%c0, %c0_0] : memref<2x4xf32, #tpu.memory_space<vmem>>, vector<2x4xf32>
    %c0_1 = arith.constant 0 : index
    %c0_2 = arith.constant 0 : index
    %1 = vector.load %arg2[%c0_1, %c0_2] : memref<4x128xf32, #tpu.memory_space<vmem>>, vector<4x128xf32>
    %cst = arith.constant dense<0.000000e+00> : vector<2x128xf32>
    %2 = tpu.matmul %0, %1, %cst {dimension_numbers = #tpu.dot_dimension_numbers<[1], [0], [0], [1], [0, 0, 1, 1], [], []>} : vector<2x4xf32>, vector<4x128xf32>, vector<2x128xf32> -> vector<2x128xf32>
    %c0_3 = arith.constant 0 : index
    %c0_4 = arith.constant 0 : index
    %3 = vector.load %arg3[%c0_3, %c0_4] : memref<1x128xf32, #tpu.memory_space<vmem>>, vector<1x128xf32>
    %4 = vector.broadcast %3 : vector<1x128xf32> to vector<2x128xf32>
    %5 = arith.addf %2, %4 : vector<2x128xf32>
    %cst_5 = arith.constant 0.000000e+00 : f32
    %6 = vector.broadcast %cst_5 : f32 to vector<2x128xf32>
    %7 = arith.maximumf %5, %6 : vector<2x128xf32>
    %c0_6 = arith.constant 0 : index
    %c0_7 = arith.constant 0 : index
    %8 = vector.load %arg4[%c0_6, %c0_7] : memref<128x128xf32, #tpu.memory_space<vmem>>, vector<128x128xf32>
    %cst_8 = arith.constant dense<0.000000e+00> : vector<2x128xf32>
    %9 = tpu.matmul %7, %8, %cst_8 {dimension_numbers = #tpu.dot_dimension_numbers<[1], [0], [0], [1], [0, 0, 1, 1], [], []>} : vector<2x128xf32>, vector<128x128xf32>, vector<2x128xf32> -> vector<2x128xf32>
    %c0_9 = arith.constant 0 : index
    %c0_10 = arith.constant 0 : index
    %10 = vector.load %arg5[%c0_9, %c0_10] : memref<1x128xf32, #tpu.memory_space<vmem>>, vector<1x128xf32>
    %11 = vector.broadcast %10 : vector<1x128xf32> to vector<2x128xf32>
    %12 = arith.addf %9, %11 : vector<2x128xf32>
    %cst_11 = arith.constant 0.000000e+00 : f32
    %13 = vector.broadcast %cst_11 : f32 to vector<2x128xf32>
    %14 = arith.maximumf %12, %13 : vector<2x128xf32>
    %c0_12 = arith.constant 0 : index
    %c0_13 = arith.constant 0 : index
    %15 = vector.load %arg6[%c0_12, %c0_13] : memref<1x128xf32, #tpu.memory_space<vmem>>, vector<1x128xf32>
    %16 = vector.broadcast %15 : vector<1x128xf32> to vector<2x128xf32>
    %17 = arith.mulf %14, %16 : vector<2x128xf32>
    %cst_14 = arith.constant dense<0.000000e+00> : vector<2xf32>
    %18 = vector.multi_reduction <add>, %17, %cst_14 [1] : vector<2x128xf32> to vector<2xf32>
    %19 = vector.shape_cast %18 : vector<2xf32> to vector<2x1xf32>
    %c0_15 = arith.constant 0 : index
    %c0_16 = arith.constant 0 : index
    %20 = memref.load %arg7[%c0_15, %c0_16] : memref<1x1xf32, #tpu.memory_space<smem>>
    %21 = vector.broadcast %20 : f32 to vector<2x1xf32>
    %22 = arith.addf %19, %21 : vector<2x1xf32>
    %c0_17 = arith.constant 0 : index
    %c0_18 = arith.constant 0 : index
    %23 = vector.load %arg8[%c0_17, %c0_18] : memref<2x1xf32, #tpu.memory_space<vmem>>, vector<2x1xf32>
    tpu.vector_store %arg8[%c0_17, %c0_18], %22 {strides = array<i32>} : memref<2x1xf32, #tpu.memory_space<vmem>>, vector<2x1xf32>,
    return
  }
  func.func @transform_0(%arg0: i32) -> (i32, i32) {
    %c0_i32 = arith.constant 0 : i32
    %c0_i32_0 = arith.constant 0 : i32
    return %arg0, %c0_i32 : i32, i32
  }
  func.func @transform_1(%arg0: i32) -> (i32, i32) {
    %c0_i32 = arith.constant 0 : i32
    %c0_i32_0 = arith.constant 0 : i32
    %c0_i32_1 = arith.constant 0 : i32
    return %c0_i32, %c0_i32_0 : i32, i32
  }
  func.func @transform_2(%arg0: i32) -> (i32, i32) {
    %c0_i32 = arith.constant 0 : i32
    %c0_i32_0 = arith.constant 0 : i32
    %c0_i32_1 = arith.constant 0 : i32
    return %c0_i32, %c0_i32_0 : i32, i32
  }
  func.func @transform_3(%arg0: i32) -> (i32, i32) {
    %c0_i32 = arith.constant 0 : i32
    %c0_i32_0 = arith.constant 0 : i32
    %c0_i32_1 = arith.constant 0 : i32
    return %c0_i32, %c0_i32_0 : i32, i32
  }
  func.func @transform_4(%arg0: i32) -> (i32, i32) {
    %c0_i32 = arith.constant 0 : i32
    %c0_i32_0 = arith.constant 0 : i32
    %c0_i32_1 = arith.constant 0 : i32
    return %c0_i32, %c0_i32_0 : i32, i32
  }
  func.func @transform_5(%arg0: i32) -> (i32, i32) {
    %c0_i32 = arith.constant 0 : i32
    %c0_i32_0 = arith.constant 0 : i32
    %c0_i32_1 = arith.constant 0 : i32
    return %c0_i32, %c0_i32_0 : i32, i32
  }
  func.func @transform_6(%arg0: i32) -> (i32, i32) {
    %c0_i32 = arith.constant 0 : i32
    %c0_i32_0 = arith.constant 0 : i32
    %c0_i32_1 = arith.constant 0 : i32
    return %c0_i32, %c0_i32_0 : i32, i32
  }
  func.func @transform_7(%arg0: i32) -> (i32, i32) {
    %c0_i32 = arith.constant 0 : i32
    %c0_i32_0 = arith.constant 0 : i32
    return %arg0, %c0_i32 : i32, i32
  }
}

</mosaic_0001>

<bundles_post_ra>
// kernel: tpu_custom_call.1
= control target key start
LH: loop header
LB: loop body
LE: loop exit
PB: predicated region body
PF: predicated region fallthrough
CT: control target
= control target key end

     0   :  { %13 = vsyncpa [#allocation4], 0  ;;  %s363_s24 = smov [#allocation3]   ;;  %s442_s0 = inlined_call_operand.vmem [shape: f32[2,4], index: 0, kind: input, shape index: {}]   ;;  %s443_s1 = inlined_call_operand.vmem [shape: f32[4,128], index: 1, kind: input, shape index: {}]   ;;  %s444_s2 = inlined_call_operand.vmem [shape: f32[1,128], index: 2, kind: input, shape index: {}]   ;;  %s445_s3 = inlined_call_operand.hbm [shape: f32[128,128], index: 3, kind: input, shape index: {}]   ;;  %s446_s4 = inlined_call_operand.vmem [shape: f32[1,128], index: 4, kind: input, shape index: {}]   ;;  %s447_s5 = inlined_call_operand.vmem [shape: f32[1,128], index: 5, kind: input, shape index: {}]   ;;  %s448_s6 = inlined_call_operand.<no memory space> [shape: f32[1,1], index: 6, kind: input, shape index: {}]   ;;  %s449_s7 = inlined_call_operand.vmem [shape: f32[2,1], index: 7, kind: output, shape index: {}]  }
   0x1   :  { %s25_s25 = sshll.u32 %s363_s24, 4  ;;  %s339_s28 = scalar_lea.hbm %s445_s3, 2048  ;;  %s26_s25 = int_to_ptr.vmem [resolvable:$true] %s25_s25 }
   0x2   :  { %p340_p0 = scmp.ne.s32.totalorder %s445_s3, %s339_s28  ;;  %p343_p1 = scmp.lt.u32.totalorder %s339_s28, %s445_s3 }
   0x4   :  { %p345_p2 = pnand %p343_p1, %p340_p0 }
   0x6   :  { %348 = shalt.err (!%p345_p2)
}
   0x7   :  { %s349_s10 = scalar_lea.vmem %s26_s25, 2048  ;;  %p354_p4 = scmp.lt.s32.totalorder %s26_s25, %s26_s25 }
   0x8   :  { %p350_p3 = scmp.ne.s32.totalorder %s26_s25, %s349_s10  ;;  %p355_p5 = scmp.lt.s32.totalorder %s349_s10, %s349_s10 }
   0xa   :  { %p356_p6 = por %p355_p5, %p354_p4 }
   0xc   :  { %p357_p7 = pnand %p356_p6, %p350_p3 }
   0xe   :  { %360 = shalt.err (!%p357_p7)
}
   0xf   :  { %s364_s11 = smov 128   ;;  %s365_s12 = smov 8  }
  0x10   :  { %31 = dma.hbm_to_vmem [thread:$0]  %s445_s3, 2048, %s26_s25, [#allocation4], %s364_s11, %s364_s11, %s365_s12  }
  0x11   :  { %361 = dma.done.wait [#allocation4], 2048  }
  0x12   :  { %362 = vsyncadd [#allocation4], 4294965248  ;;  %v366_v0 = vmov 0.0   ;;  %vm367_vm0 = vmmov 0   ;;  %v368_v1 = vmov 0.0|0.0   ;;  %vm54_vm1 = vcmask 1043456  }
  0x13   :  { %269 = vmatprep.subr.mxu0 %v366_v0  ;;  %271 = vmatprep.mubr.msk.f32.mxu0 %vm367_vm0, %v366_v0  ;;  %vm50_vm2 = vcmask 31744   ;;  %v42_v2 = vld [vmem:[%s443_s1] sm:$0xf]  ;;  %v130_v5 = vld [vmem:[#allocation3 + $0x8] sm:$0xff]  ;;  %v131_v6 = vld [vmem:[#allocation3 + $0x10] sm:$0xff]  ;;  %vm231_vm3 = vcmask 1041408   ;;  %v236_v41 = vstv %s448_s6 }
  0x14   :  { %309 = vmatprep.subr.bf16.mxu1 %v368_v1  ;;  %306 = vmatprep.mubr.msk.f32.mxu1 %vm367_vm0, %v366_v0  ;;  %v41_v3 = vld [vmem:[%s442_s0] sm:$0x3]  ;;  %v132_v7 = vld [vmem:[#allocation3 + $0x18] sm:$0xff]  ;;  %v134_v11 = vld [vmem:[#allocation3 + $0x28] sm:$0xff]  ;;  %vm238_vm4 = vcmask 1024  }
  0x15   :  { %v129_v4 = vld [vmem:[#allocation3] sm:$0xff]  ;;  %270 = vmatpush3.msk.msra.mxu0 %vm54_vm1, %v42_v2  ;;  %v313_v9 = vpack.c.bf16 %v132_v7, %v131_v6  ;;  %v135_v13 = vld [vmem:[#allocation3 + $0x30] sm:$0xff]  ;;  %v136_v14 = vld [vmem:[#allocation3 + $0x38] sm:$0xff] }
  0x16   :  { %272 = vmatmul.mubr.msk.f32.vlgmr.msra.gmra.mrb[0].mxu0 %vm50_vm2, %v41_v3  ;;  %v310_v8 = vpack.c.bf16 %v130_v5, %v129_v4  ;;  %v133_v10 = vld [vmem:[#allocation3 + $0x20] sm:$0xff]  ;;  %v319_v15 = vpack.c.bf16 %v136_v14, %v135_v13  ;;  %v138_v17 = vld [vmem:[#allocation3 + $0x48] sm:$0xff]  ;;  %v139_v19 = vld [vmem:[#allocation3 + $0x50] sm:$0xff] }
  0x17   :  { %v316_v12 = vpack.c.bf16 %v134_v11, %v133_v10  ;;  %v137_v16 = vld [vmem:[#allocation3 + $0x40] sm:$0xff]  ;;  %v140_v20 = vld [vmem:[#allocation3 + $0x58] sm:$0xff]  ;;  %v142_v23 = vld [vmem:[#allocation3 + $0x68] sm:$0xff] }
  0x18   :  { %311 = vmatpush3.bf16.msra.mxu1 %v310_v8  ;;  %v322_v18 = vpack.c.bf16 %v138_v17, %v137_v16  ;;  %v325_v21 = vpack.c.bf16 %v140_v20, %v139_v19  ;;  %v141_v22 = vld [vmem:[#allocation3 + $0x60] sm:$0xff]  ;;  %v143_v25 = vld [vmem:[#allocation3 + $0x70] sm:$0xff]  ;;  %v144_v26 = vld [vmem:[#allocation3 + $0x78] sm:$0xff] }
  0x19   :  { %312 = vmatprep.subr.bf16.mxu1 %v368_v1  ;;  %v328_v24 = vpack.c.bf16 %v142_v23, %v141_v22  ;;  %v331_v27 = vpack.c.bf16 %v144_v26, %v143_v25  ;;  %v245_v28 = vld [vmem:[%s444_s2] ss:$0 sm:$0xff] }
  0x1a   :  { %v248_v33 = vld [vmem:[%s446_s4] ss:$0 sm:$0xff] }
  0x1b   :  { %v249_v37 = vld [vmem:[%s447_s5] ss:$0 sm:$0xff] }
  0x1c   :  { %314 = vmatpush3.bf16.msra.mxu1 %v313_v9 }
  0x1d   :  { %315 = vmatprep.subr.bf16.mxu1 %v368_v1 }
  0x20   :  { %317 = vmatpush3.bf16.msra.mxu1 %v316_v12 }
  0x21   :  { %318 = vmatprep.subr.bf16.mxu1 %v368_v1 }
  0x24   :  { %320 = vmatpush3.bf16.msra.mxu1 %v319_v15 }
  0x25   :  { %321 = vmatprep.subr.bf16.mxu1 %v368_v1 }
  0x28   :  { %323 = vmatpush3.bf16.msra.mxu1 %v322_v18 }
  0x29   :  { %324 = vmatprep.subr.bf16.mxu1 %v368_v1 }
  0x2c   :  { %326 = vmatpush3.bf16.msra.mxu1 %v325_v21 }
  0x2d   :  { %327 = vmatprep.subr.bf16.mxu1 %v368_v1 }
  0x30   :  { %329 = vmatpush3.bf16.msra.mxu1 %v328_v24 }
  0x31   :  { %330 = vmatprep.subr.bf16.mxu1 %v368_v1 }
  0x34   :  { %332 = vmatpush3.bf16.msra.mxu1 %v331_v27 }
  0xe9   :  { %v124_v29 = vpop.f32.mrb[0].mxu0 }
  0xea   :  { %v125_v30 = vadd.f32 %v245_v28, %v124_v29  ;;  %v273_v31 = vpop.f32.mrb[1].mxu0 }
  0xec   :  { %v128_v32 = vmax.f32 %v125_v30, 0.0 }
  0xee   :  { %307 = vmatmul.mubr.f32.vlgmr.msra.gmra.mrb[0].mxu1 %v128_v32 }
 0x1c1   :  { %v218_v34 = vpop.f32.mrb[0].mxu1 }
 0x1c2   :  { %v219_v35 = vadd.f32 %v248_v33, %v218_v34  ;;  %v308_v36 = vpop.f32.mrb[1].mxu1 }
 0x1c4   :  { %v222_v38 = vmax.f32 %v219_v35, 0.0 }
 0x1c6   :  { %v230_v39 = vmul.f32 %v249_v37, %v222_v38 }
 0x1c8   :  { %v232_v40 = vsel %vm231_vm3, %v230_v39, 0.0 }
 0x1c9   :  { %233 = vadd.xlane.f32.xlu0 %v232_v40 }
 0x256   :  { %v234_v42 = vpop.xlane.xlu0 %233 }
 0x257   :  { %v237_v43 = vadd.f32 %v236_v41, %v234_v42 }
 0x259   :  { %239 = vst.msk [vmem:[%s449_s7] sm:$0x3] %vm238_vm4, %v237_v43 }
 0x25a   :  { %244 = vsyncpa [#allocation4], 1 }

</bundles_post_ra>
